<compile_context>
chip_gen: v7x
topology: tpu7x:2x2x1
jax: 0.10.0
libtpu: 0.0.40
codegen_flags: <defaults>
</compile_context>

<pallas_src>
import jax
import jax.numpy as jnp
from jax import lax
from jax.experimental import pallas as pl
from jax.experimental.pallas import tpu as pltpu


# Largest lane width for which the (lane, lane) f32 Gram stays register-sized.
_GRAM_MAX_LANE = 256


def _make_kernel(pack, d_out):
    """Build the per-tile partial-sum kernel for s = 1^T (W^T W) 1."""
    lane = pack * d_out
    use_gram = lane <= _GRAM_MAX_LANE

    def _accumulate(out_ref, partial):
        # Resident accumulator across the reduction (tile) grid axis.
        @pl.when(pl.program_id(1) == 0)
        def _():
            out_ref[...] = jnp.zeros_like(out_ref)
        out_ref[...] += partial                 # (1,1) broadcast over (8,128)

    def _full_sum(a):
        # lane reduce then sublane reduce of a small f32 tile -> (1, 1)
        return jnp.sum(jnp.sum(a, axis=1, keepdims=True), axis=0, keepdims=True)

    if use_gram and pack > 1:
        # Lane-dense packed view: keep only the block-diagonal Gram blocks.
        def kernel(mask_ref, w_ref, out_ref):
            w = w_ref[...]
            g = lax.dot_general(w, w, (((0,), (0,)), ((), ())),
                                preferred_element_type=jnp.float32)   # (128,128)
            _accumulate(out_ref, _full_sum(g * mask_ref[...]))
    elif use_gram:
        # Raw view: the full Gram sum already equals 1^T W^T W 1.
        def kernel(w_ref, out_ref):
            w = w_ref[...]
            g = lax.dot_general(w, w, (((0,), (0,)), ((), ())),
                                preferred_element_type=jnp.float32)   # (lane,lane)
            _accumulate(out_ref, _full_sum(g))
    else:
        # Wide head: row-sums on the MXU (replicated across 128 lanes so every
        # temp stays lane-dense), then square + reduce; divide out the 128x
        # replication at the end.
        def kernel(w_ref, out_ref):
            w = w_ref[...]
            u = jnp.dot(w, jnp.ones((lane, 128), dtype=w.dtype),
                        preferred_element_type=jnp.float32)           # (tile,128)
            _accumulate(out_ref, _full_sum(u * u) * jnp.float32(1.0 / 128.0))

    return kernel, use_gram


def _vmem_capacity_bytes():
    try:
        cap = int(getattr(pltpu.get_tpu_info(), "vmem_capacity_bytes"))
        if cap > 0:
            return cap
    except Exception:
        pass
    return 64 << 20   # conservative default: v7x per-TensorCore VMEM


def _choose_tiling(n_rows, row_bytes, max_tile_bytes):
    """Pick (tile_rows, padded_rows).

    tile_rows is a multiple of 8 (or the whole row extent), its VMEM slab fits
    `max_tile_bytes` (row_bytes already includes lane padding / temps), and the
    search prefers tile counts that keep the 2-way core split even.  If no
    aligned divisor exists, rows are zero-padded (zero rows add 0 to s).
    """
    max_rows = max(8, int(max_tile_bytes // row_bytes))
    if n_rows <= max_rows:
        return n_rows, n_rows                       # single block
    cap = max(8, (max_rows // 8) * 8)
    best_any = None
    best_even = None
    t = cap
    while t >= 8:
        if n_rows % t == 0:
            if best_any is None:
                best_any = t
            if (n_rows // t) % 2 == 0:
                best_even = t
                break
        t -= 8
    if best_even is not None and (best_any is None or 2 * best_even >= best_any):
        return best_even, n_rows
    if best_any is not None:
        return best_any, n_rows
    # No aligned divisor: pad rows up to a multiple of the largest legal tile.
    padded = ((n_rows + cap - 1) // cap) * cap
    return cap, padded


def jacobian_reg(x, W, *, tile_rows=None, eps=1e-9):
    """JacobianReg(n=-1).forward(x, y) with y = f(x) = x.reshape(B, -1) @ W."""
    B = x.shape[0]
    d_in, d_out = W.shape
    assert x.reshape(B, -1).shape[1] == d_in   # x only fixes B / shape parity

    # --- lane-dense packing for narrow heads -------------------------------
    if d_out < 128 and 128 % d_out == 0 and d_in % (128 // d_out) == 0:
        pack = 128 // d_out
    else:
        pack = 1
    lane = pack * d_out
    Wv = W.reshape(d_in // pack, lane) if pack > 1 else W   # row-major, no copy
    n_rows = Wv.shape[0]

    kernel, use_gram = _make_kernel(pack, d_out)
    use_mask = use_gram and pack > 1

    # --- VMEM-accurate tile sizing -----------------------------------------
    padded_lane = ((lane + 127) // 128) * 128               # VMEM lane padding
    row_bytes = padded_lane * W.dtype.itemsize
    if not use_gram:
        row_bytes += 128 * 4                                # (tile,128) f32 temp
    vmem_cap = _vmem_capacity_bytes()
    max_tile_bytes = min(16 << 20, max(4 << 20, (vmem_cap - (16 << 20)) // 3))

    if tile_rows is None:
        tile_rows, padded_rows = _choose_tiling(n_rows, row_bytes, max_tile_bytes)
    else:
        assert tile_rows == n_rows or tile_rows % 8 == 0, tile_rows
        padded_rows = ((n_rows + tile_rows - 1) // tile_rows) * tile_rows

    if padded_rows != n_rows:
        Wv = jnp.pad(Wv, ((0, padded_rows - n_rows), (0, 0)))  # zero rows add 0

    num_tiles = padded_rows // tile_rows
    # Two "parallel" groups over the tile axis -> v7x's 2 TensorCores each
    # stream half of W; on 1-TC chips this is just an outer loop.
    split = 2 if (num_tiles >= 2 and num_tiles % 2 == 0) else 1
    tiles_per_split = num_tiles // split

    # --- specs / compiler params --------------------------------------------
    w_spec = pl.BlockSpec((tile_rows, lane),
                          lambda c, i: (c * tiles_per_split + i, 0))
    operands = (Wv,)
    in_specs = [w_spec]
    mask_bytes = 0
    if use_mask:
        blk = jnp.arange(lane) // d_out
        mask = (blk[:, None] == blk[None, :]).astype(jnp.float32)   # (128,128)
        in_specs = [pl.BlockSpec((lane, lane), lambda c, i: (0, 0)), w_spec]
        operands = (mask, Wv)
        mask_bytes = lane * lane * 4

    tile_bytes = tile_rows * row_bytes
    # One double-buffered input stream dominates; keep default Buffered(2) and
    # spend the rest of the budget on tile size, with headroom for small temps.
    vmem_limit = int(min(max(2 * tile_bytes + (8 << 20), 32 << 20),
                         max(vmem_cap - (8 << 20), 16 << 20)))

    cost = pl.CostEstimate(
        flops=2 * padded_rows * lane * (lane if use_gram else 128),
        transcendentals=0,
        bytes_accessed=int(Wv.size) * Wv.dtype.itemsize + mask_bytes
                       + split * 8 * 128 * 4,
    )

    partials = pl.pallas_call(
        kernel,
        out_shape=jax.ShapeDtypeStruct((split * 8, 128), jnp.float32),
        grid=(split, tiles_per_split),
        in_specs=in_specs,
        # One lane-dense (8,128) partial-sum tile per parallel split, resident
        # across the reduction axis (accumulator pattern, unmasked stores).
        out_specs=pl.BlockSpec((8, 128), lambda c, i: (c, 0)),
        compiler_params=pltpu.CompilerParams(
            dimension_semantics=("parallel", "arbitrary"),
            vmem_limit_bytes=vmem_limit),
        cost_estimate=cost,
    )(*operands)

    # Scalar epilogue: combine per-split partials, cholesky-retry guard, log.
    s = jnp.sum(partials[::8, 0])
    # torch's try/except cholesky fallback: the 1x1 cholesky fails only for
    # s <= 0, in which case the retry uses s + 1e-9.
    jac = jnp.where(s > 0, s, s + jnp.float32(eps))
    return jnp.abs(0.5 * jnp.log(jac))


def _ref_jacobian_reg(x, W, eps=1e-9):
    """Pure-JAX mirror of the torch.autograd.grad path via jax.vjp."""
    B = x.shape[0]
    f = lambda xx: xx.reshape(B, -1) @ W
    y, vjp_fn = jax.vjp(f, x)
    (jv,) = vjp_fn(jnp.ones_like(y))
    jv = jv.reshape(B, -1)
    jac = jnp.sum(jv * jv, axis=1)                # per-batch 1x1 gram
    jac = jnp.where(jac > 0, jac, jac + eps)      # cholesky-retry guard
    return jnp.mean(jnp.abs(0.5 * jnp.log(jac)))


if __name__ == "__main__":
    key = jax.random.PRNGKey(0)
    kx, kw1, kw2, kw3 = jax.random.split(key, 4)
    B, C, H, Wd = 2, 4, 16, 16
    d_in = C * H * Wd                              # 1024

    x = jax.random.normal(kx, (B, C, H, Wd), dtype=jnp.float32)

    # Narrow head (d_out=32): lane-dense packed path (pack=4, masked Gram).
    W1 = jax.random.normal(kw1, (d_in, 32), dtype=jnp.float32) * 0.05
    ref1 = _ref_jacobian_reg(x, W1)
    out1_tiled = jax.block_until_ready(jacobian_reg(x, W1, tile_rows=64))  # grid + 2-way split
    out1_auto = jax.block_until_ready(jacobian_reg(x, W1))                 # auto single block
    assert jnp.allclose(out1_tiled, ref1, rtol=1e-4, atol=1e-4), (out1_tiled, ref1)
    assert jnp.allclose(out1_auto, ref1, rtol=1e-4, atol=1e-4), (out1_auto, ref1)

    # 128-wide head: unmasked Gram path (pack=1).
    W2 = jax.random.normal(kw2, (d_in, 128), dtype=jnp.float32) * 0.05
    out2 = jax.block_until_ready(jacobian_reg(x, W2))
    ref2 = _ref_jacobian_reg(x, W2)
    assert jnp.allclose(out2, ref2, rtol=1e-4, atol=1e-4), (out2, ref2)

    # Wide head (d_out=640 > 256): MXU row-sum path.
    W3 = jax.random.normal(kw3, (d_in, 640), dtype=jnp.float32) * 0.05
    out3 = jax.block_until_ready(jacobian_reg(x, W3))
    ref3 = _ref_jacobian_reg(x, W3)
    assert jnp.allclose(out3, ref3, rtol=1e-4, atol=1e-4), (out3, ref3)

    print("KERNEL_OK")
</pallas_src>

<mosaic_0001>
module attributes {stable_mosaic.version = 11 : i64} {
  func.func @kernel(%arg0: i32, %arg1: i32, %arg2: memref<128x128xf32, #tpu.memory_space<vmem>>, %arg3: memref<64x128xf32, #tpu.memory_space<vmem>>, %arg4: memref<8x128xf32, #tpu.memory_space<vmem>>) attributes {dimension_semantics = [#tpu.dimension_semantics<parallel>, #tpu.dimension_semantics<arbitrary>], iteration_bounds = array<i64: 2, 2>, scalar_prefetch = 0 : i64, scratch_operands = 0 : i64, tpu.core_type = #tpu.core_type<tc>, window_params = [{pipeline_mode = #tpu.pipeline_mode<synchronous>, transform_indices = @transform_0, window_bounds = array<i64: 128, 128>}, {transform_indices = @transform_1, window_bounds = array<i64: 64, 128>}, {transform_indices = @transform_2, window_bounds = array<i64: 8, 128>}]} {
    %c0 = arith.constant 0 : index
    %c0_0 = arith.constant 0 : index
    %0 = vector.load %arg3[%c0, %c0_0] : memref<64x128xf32, #tpu.memory_space<vmem>>, vector<64x128xf32>
    %cst = arith.constant dense<0.000000e+00> : vector<128x128xf32>
    %1 = tpu.matmul %0, %0, %cst {dimension_numbers = #tpu.dot_dimension_numbers<[0], [0], [1], [1], [0, 1, 1, 1], [], []>} : vector<64x128xf32>, vector<64x128xf32>, vector<128x128xf32> -> vector<128x128xf32>
    %c0_1 = arith.constant 0 : index
    %c0_2 = arith.constant 0 : index
    %2 = vector.load %arg2[%c0_1, %c0_2] : memref<128x128xf32, #tpu.memory_space<vmem>>, vector<128x128xf32>
    %3 = arith.mulf %1, %2 : vector<128x128xf32>
    %cst_3 = arith.constant dense<0.000000e+00> : vector<128xf32>
    %4 = vector.multi_reduction <add>, %3, %cst_3 [1] : vector<128x128xf32> to vector<128xf32>
    %5 = vector.shape_cast %4 : vector<128xf32> to vector<128x1xf32>
    %cst_4 = arith.constant dense<0.000000e+00> : vector<1xf32>
    %6 = vector.multi_reduction <add>, %5, %cst_4 [0] : vector<128x1xf32> to vector<1xf32>
    %7 = vector.shape_cast %6 : vector<1xf32> to vector<1x1xf32>
    %c0_i32 = arith.constant 0 : i32
    %8 = arith.cmpi eq, %arg1, %c0_i32 : i32
    %9 = arith.extui %8 : i1 to i32
    %c0_i32_5 = arith.constant 0 : i32
    %10 = arith.cmpi ne, %9, %c0_i32_5 : i32
    scf.if %10 {
      %cst_10 = arith.constant 0.000000e+00 : f32
      %15 = vector.broadcast %cst_10 : f32 to vector<8x128xf32>
      %c0_11 = arith.constant 0 : index
      %c0_12 = arith.constant 0 : index
      %16 = vector.load %arg4[%c0_11, %c0_12] : memref<8x128xf32, #tpu.memory_space<vmem>>, vector<8x128xf32>
      tpu.vector_store %arg4[%c0_11, %c0_12], %15 {strides = array<i32>} : memref<8x128xf32, #tpu.memory_space<vmem>>, vector<8x128xf32>,
    } else {
    }
    %c0_6 = arith.constant 0 : index
    %c0_7 = arith.constant 0 : index
    %11 = vector.load %arg4[%c0_6, %c0_7] : memref<8x128xf32, #tpu.memory_space<vmem>>, vector<8x128xf32>
    %12 = vector.broadcast %7 : vector<1x1xf32> to vector<8x128xf32>
    %13 = arith.addf %11, %12 : vector<8x128xf32>
    %c0_8 = arith.constant 0 : index
    %c0_9 = arith.constant 0 : index
    %14 = vector.load %arg4[%c0_8, %c0_9] : memref<8x128xf32, #tpu.memory_space<vmem>>, vector<8x128xf32>
    tpu.vector_store %arg4[%c0_8, %c0_9], %13 {strides = array<i32>} : memref<8x128xf32, #tpu.memory_space<vmem>>, vector<8x128xf32>,
    return
  }
  func.func @transform_0(%arg0: i32, %arg1: i32) -> (i32, i32) {
    %c0_i32 = arith.constant 0 : i32
    %c0_i32_0 = arith.constant 0 : i32
    %c0_i32_1 = arith.constant 0 : i32
    return %c0_i32, %c0_i32_0 : i32, i32
  }
  func.func @transform_1(%arg0: i32, %arg1: i32) -> (i32, i32) {
    %c2_i32 = arith.constant 2 : i32
    %0 = arith.muli %arg0, %c2_i32 : i32
    %1 = arith.addi %0, %arg1 : i32
    %c0_i32 = arith.constant 0 : i32
    %c0_i32_0 = arith.constant 0 : i32
    return %1, %c0_i32 : i32, i32
  }
  func.func @transform_2(%arg0: i32, %arg1: i32) -> (i32, i32) {
    %c0_i32 = arith.constant 0 : i32
    %c0_i32_0 = arith.constant 0 : i32
    return %arg0, %c0_i32 : i32, i32
  }
}

</mosaic_0001>

<bundles_post_ra>
// kernel: tpu_custom_call.1
= control target key start
LH: loop header
LB: loop body
LE: loop exit
PB: predicated region body
PF: predicated region fallthrough
CT: control target
= control target key end

     0   :  { %s1372_s0 = inlined_call_operand.hbm [shape: f32[128,128], index: 0, kind: input, shape index: {}]   ;;  %s1373_s1 = inlined_call_operand.hbm [shape: f32[256,128], index: 1, kind: input, shape index: {}]   ;;  %s1374_s2 = inlined_call_operand.hbm [shape: f32[16,128], index: 2, kind: output, shape index: {}]  }
   0x1   :  { %1388 = sst [smem:[#allocation16_spill]] %s1372_s0 }
   0x2   :  { %1389 = sst [smem:[#allocation17_spill]] %s1374_s2 }
   0x3   :  { %7 = vsyncpa [#allocation3], 0 }
   0x4   :  { %8 = vsyncpa [#allocation6], 0 }
   0x5   :  { %10 = vsyncpa [#allocation6 + $0x1], 0 }
   0x6   :  { %11 = vsyncpa [#allocation4], 0 }
   0x7   :  { %13 = vsyncpa [#allocation4 + $0x1], 0  ;;  %s1083_s9 = smov 0   ;;  %s1085_s10 = smov 0  }
   0x8   :  { %s1087_s11 = smov 0   ;;  %s1089_s12 = smov 0  }
   0x9   :  { %s1091_s13 = smov 0   ;;  %s1093_s14 = smov 0  }
   0xa   :  { %s1095_s15 = smov 0   ;;  %s1097_s16 = smov 0  }
   0xb   :  { %s1099_s17 = smov 0   ;;  %s1101_s18 = smov 0  }
   0xc   :  { %s1103_s19 = smov 0  }
   0xd LB: > { %1390 = sst [smem:[#allocation11_spill]] %s1020_s9  ;;  %s634_s20 = sadd.s32 4294967295, %s1060_s19   ;;  %s1060_s19 = sphi %s1103_s19, %s19_s19   ;;  %s1056_s18 = sphi %s1101_s18, %s1425_s18   ;;  %s1052_s17 = sphi %s1099_s17, %s1424_s17   ;;  %s1048_s16 = sphi %s1097_s16, %s1423_s16   ;;  %s1044_s15 = sphi %s1095_s15, %s1416_s15   ;;  %s1040_s14 = sphi %s1093_s14, %s1422_s14   ;;  %s1036_s13 = sphi %s1091_s13, %s1421_s13   ;;  %s1032_s12 = sphi %s1089_s12, %s1420_s12   ;;  %s1028_s11 = sphi %s1087_s11, %s1419_s11   ;;  %s1024_s10 = sphi %s1085_s10, %s1418_s10   ;;  %s1020_s9 = sphi %s1083_s9, %s1417_s9  }
   0xe   : > { %1391 = sst [smem:[#allocation12_spill]] %s1048_s16  ;;  %s635_s21 = sadd.s32 4294967294, %s1060_s19  }
   0xf   : > { %1392 = sst [smem:[#allocation13_spill]] %s1052_s17  ;;  %p76_p0 = scmp.ne.s32.totalorder %s1036_s13, %s1032_s12 }
  0x10   : > { %p1139_p1 = scmp.eq.s32.totalorder %s634_s20, 0  ;;  %p99_p2 = scmp.ne.s32.totalorder %s1028_s11, %s1024_s10 }
  0x11   : > { %p100_p4 = scmp.eq.s32.totalorder %s634_s20, 3  ;;  %p105_p5 = scmp.ne.s32.totalorder %s1024_s10, %s1020_s9 }
  0x12   : > { %s1393_s22 = scalar_select %p1139_p1, 1, 0 }
  0x13   : > { %p1147_p3 = por %p1139_p1, %p76_p0  ;;  %p106_p6 = scmp.eq.s32.totalorder %s635_s21, 3 }
  0x14   : > { %p1153_p7 = por %p100_p4, %p99_p2  ;;  %p638_p8 = scmp.ge.s32.totalorder %s1060_s19, 1 }
  0x15   : > { %s1394_s23 = scalar_select %p1147_p3, 1, 0 }
  0x16   : > { %s1395_s24 = scalar_select %p1153_p7, 1, 0 }
  0x17   : > { %p1158_p9 = por %p106_p6, %p105_p5  ;;  %p113_p10 = scmp.lt.s32.totalorder %s1060_s19, 5 }
  0x18   : > { %1396 = sst [smem:[#allocation14_spill]] %s1395_s24  ;;  %s1062_s27 = smov [#allocation2]  }
  0x19   : > { %s1397_s25 = scalar_select %p1158_p9, 1, 0 }
  0x1a   : > { %p1163_p11 = pnand %p638_p8, %p113_p10  ;;  %s125_s28 = sshll.u32 %s1062_s27, 4  ;;  %s126_s28 = int_to_ptr.vmem [resolvable:$true] %s125_s28 }
  0x1b   : > { %1398 = sst [smem:[#allocation15_spill]] %s1397_s25  ;;  %s1401_s0 = sld [smem:[#allocation16_spill]] }
  0x1c   : > { %s1399_s26 = scalar_select %p1163_p11, 1, 0 }
  0x1d   : > { %p767_p12 = pneg %p1163_p11 }
  0x1f   : > { %p1171_p13 = pnand %p767_p12, %p1139_p1 }
  0x21   : > { %s876_s4 = scalar_lea.hbm %s1401_s0, 2048  ;;  %p878_p2 = pneg %p1171_p13 }
  0x22   : > { %p877_p0 = scmp.ne.s32.totalorder %s1401_s0, %s876_s4  ;;  %p883_p6 = scmp.lt.u32.totalorder %s876_s4, %s1401_s0 }
  0x24   : > { %p879_p4 = pnand %p878_p2, %p877_p0 }
  0x26   : > { %p880_p5 = pneg %p879_p4 }
  0x28   : > { %p885_p8 = pnand %p883_p6, %p880_p5 }
  0x2a   : > { %888 = shalt.err (!%p885_p8)
}
  0x2b   : > { %s889_s12 = scalar_lea.vmem %s126_s28, 2048  ;;  %p897_p7 = scmp.lt.s32.totalorder %s126_s28, %s126_s28 }
  0x2c   : > { %p890_p10 = scmp.ne.s32.totalorder %s126_s28, %s889_s12  ;;  %p898_p3 = scmp.lt.s32.totalorder %s889_s12, %s889_s12 }
  0x2e   : > { %p892_p12 = pnand %p890_p10, %p878_p2  ;;  %p899_p1 = por %p898_p3, %p897_p7 }
  0x30   : > { %p893_p9 = pneg %p892_p12 }
  0x32   : > { %p900_p11 = pnand %p899_p1, %p893_p9 }
  0x34   : > { %903 = shalt.err (!%p900_p11)
}
  0x35   : > { %s1380_s20 = smov 128   ;;  %s1381_s21 = smov 8  }
  0x36   : > { %770 = dma.hbm_to_vmem [thread:$0]  (!%p1171_p13), %s1401_s0, 2048, %s126_s28, [#allocation3], %s1380_s20, %s1380_s20, %s1381_s21  }
  0x37   : > { %s89_s3 = sadd.s32 1, %s1028_s11  ;;  %s28_s4 = sadd.s32 1, %s1052_s17 }
  0x38   : > { %p29_p1 = scmp.ge.s32.totalorder %s28_s4, 2  ;;  %s31_s5 = sadd.s32 1, %s1056_s18 }
  0x39   : > { %s636_s6 = sshll.u32 %s1056_s18, 1  ;;  %s63_s7 = sadd.s32 1, %s1040_s14 }
  0x3a   : > { %s1427_s4 = smov (%p29_p1, %s28_s4), 0  ;;  %s1429_s5 = smov (!%p29_p1, %s31_s5), %s1056_s18 }
  0x3b   : > { %p70_p3 = scmp.ne.s32.totalorder %s1040_s14, %s1036_s13  ;;  %p33_p7 = scmp.ge.s32.totalorder %s1429_s5, 2 }
  0x3c   : > { %p71_p9 = scmp.eq.s32.totalorder %s1060_s19, 0  ;;  %s57_s29 = sadd.s32 %s1052_s17, %s636_s6 }
  0x3d   : > { %p780_p11 = scmp.lt.s32.totalorder %s1060_s19, 4  ;;  %s1431_s5 = smov (%p33_p7, %s1429_s5), 0 }
  0x3e   : > { %p1209_p13 = por %p71_p9, %p70_p3  ;;  %s139_s8 = sand.u32 1, %s1040_s14  }
  0x3f   : > { %s637_s12 = sshll.u32 %s1431_s5, 1  ;;  %s86_s27 = ssub.s32 %s1056_s18, %s1431_s5 }
  0x40   : > { %s59_s30 = sadd.s32 %s637_s12, %s1427_s4  ;;  %p87_p0 = scmp.eq.s32.totalorder %s86_s27, 0 }
  0x41   : > { %s60_s20 = ssub.s32 %s57_s29, %s59_s30  ;;  %s641_s21 = sshll.u32 %s139_s8, 6 }
  0x42   : > { %p61_p2 = scmp.eq.s32.totalorder %s60_s20, 0  ;;  %s670_s17 = sshll.u32 %s57_s29, 10 }
  0x43   : > { %s1219_s6 = scalar_select %p87_p0, %s1028_s11, %s89_s3  }
  0x44   : > { %s1222_s0 = scalar_select %p61_p2, %s1040_s14, %s63_s7  }
  0x45   : > { %s143_s25 = scalar_lea.vmem [#allocation5], %s641_s21  ;;  %s1227_s16 = scalar_lea.hbm %s1373_s1, %s670_s17 }
  0x46   : > { %s152_s9 = sshll.u32 %s143_s25, 4  ;;  %p1235_p4 = pnand %p780_p11, %p1209_p13  ;;  %s1229_s9 = int_to_ptr.vmem [resolvable:$true] %s152_s9 }
  0x47   : > { %s1239_s25 = scalar_lea.sflag [#allocation6], %s139_s8  ;;  %s904_s21 = scalar_lea.hbm %s1227_s16, 1024 }
  0x48   : > { %p905_p5 = scmp.ne.s32.totalorder %s1227_s16, %s904_s21  ;;  %p906_p6 = pneg %p1235_p4 }
  0x49   : > { %s909_s24 = scalar_lea.hbm %s1373_s1, 4096  ;;  %p910_p12 = scmp.lt.u32.totalorder %s1227_s16, %s1373_s1 }
  0x4a   : > { %p907_p8 = pnand %p906_p6, %p905_p5  ;;  %p911_p1 = scmp.lt.u32.totalorder %s909_s24, %s904_s21 }
  0x4b   : > { %p913_p7 = scmp.lt.u32.totalorder %s904_s21, %s1227_s16 }
  0x4c   : > { %p908_p10 = pneg %p907_p8  ;;  %p912_p3 = por %p911_p1, %p910_p12 }
  0x4e   : > { %p914_p9 = por %p913_p7, %p912_p3 }
  0x50   : > { %p915_p11 = pnand %p914_p9, %p908_p10 }
  0x52   : > { %918 = shalt.err (!%p915_p11)
}
  0x53   : > { %s919_s29 = scalar_lea.vmem %s1229_s9, 1024  ;;  %s1065_s28 = smov [#allocation5]  }
  0x54   : > { %p920_p13 = scmp.ne.s32.totalorder %s1229_s9, %s919_s29  ;;  %s924_s8 = sshll.u32 %s1065_s28, 4  ;;  %s925_s8 = int_to_ptr.vmem [resolvable:$false] %s924_s8 }
  0x55   : > { %s926_s12 = scalar_lea.vmem %s925_s8, 2048  ;;  %p927_p5 = scmp.lt.s32.totalorder %s1229_s9, %s925_s8 }
  0x56   : > { %p922_p0 = pnand %p920_p13, %p906_p6  ;;  %p928_p8 = scmp.lt.s32.totalorder %s926_s12, %s919_s29 }
  0x58   : > { %p923_p2 = pneg %p922_p0  ;;  %p929_p12 = por %p928_p8, %p927_p5 }
  0x5a   : > { %p930_p1 = pnand %p929_p12, %p923_p2 }
  0x5c   : > { %933 = shalt.err (!%p930_p1)
}
  0x5d   : > { %s1404_s27 = smov 8   ;;  %s1405_s30 = smov 128  }
  0x5e   : > { %774 = dma.hbm_to_vmem [thread:$0]  (!%p1235_p4), %s1227_s16, 1024, %s1229_s9, %s1239_s25, %s1405_s30, %s1405_s30, %s1404_s27  }
  0x5f   : > { %p1406_p6 = scmp.ne.s32.totalorder %s1399_s26, 0 }
  0x60   : > { %p1407_p10 = scmp.ne.s32.totalorder (!%p1406_p6), %s1393_s22, 0 }
  0x61   : > { %164 = sbr.rel (%p1406_p6) target bundleno = 700 (0x2bc), region = 28 }
  0x68   : > { %1007 = dma.done.wait (%p1407_p10), [#allocation3], 2048  }
  0x69   : > { %1009 = vsyncadd (%p1407_p10), [#allocation3], 4294965248  ;;  %s170_s21 = sand.u32 1, %s1036_s13   ;;  %p1408_p3 = scmp.ne.s32.totalorder %s1394_s23, 0 }
  0x6a   : > { %s647_s20 = sshll.u32 %s170_s21, 6  ;;  %s171_s2 = scalar_lea.sflag [#allocation6], %s170_s21 }
  0x6b   : > { %s174_s17 = scalar_lea.vmem [#allocation5], %s647_s20 }
  0x6c   : > { %1011 = dma.done.wait (%p1408_p3), %s171_s2, 1024  }
  0x6d   : > { %1013 = vsyncadd (%p1408_p3), %s171_s2, 4294966272  ;;  %s192_s9 = sand.u32 1, %s1024_s10   ;;  %v198_v0 = vld [vmem:[%s174_s17] sm:$0xff]  ;;  %v199_v1 = vld [vmem:[%s174_s17 + $0x8] sm:$0xff]  ;;  %vm238_vm0 = vcmask 523264   ;;  %p665_p4 = scmp.ne.s32.totalorder %s1044_s15, 0 }
  0x6e   : > { %s1284_s16 = sshll.u32 %s192_s9, 3  ;;  %206 = vxpose.xlu0.b32.start [1/8] (short) %v198_v0, 128  ;;  %v735_v2 = vpack.c.bf16 %v199_v1, %v198_v0  ;;  %v200_v3 = vld [vmem:[%s174_s17 + $0x10] sm:$0xff]  ;;  %v201_v4 = vld [vmem:[%s174_s17 + $0x18] sm:$0xff]  ;;  %v202_v6 = vld [vmem:[%s174_s17 + $0x20] sm:$0xff] }
  0x6f   : > { %v739_v5 = vpack.c.bf16 %v201_v4, %v200_v3  ;;  %v203_v7 = vld [vmem:[%s174_s17 + $0x28] sm:$0xff]  ;;  %v204_v9 = vld [vmem:[%s174_s17 + $0x30] sm:$0xff]  ;;  %v205_v10 = vld [vmem:[%s174_s17 + $0x38] sm:$0xff]  ;;  %s194_s22 = scalar_lea.vmem [#allocation7], %s1284_s16 }
  0x70   : > { %736 = vmatprep.subr.bf16.mxu0 %v735_v2  ;;  %751 = vmatprep.subr.bf16.mxu1 %v735_v2  ;;  %v743_v8 = vpack.c.bf16 %v203_v7, %v202_v6  ;;  %v747_v11 = vpack.c.bf16 %v205_v10, %v204_v9  ;;  %v433_v28 = vld [vmem:[#allocation2 + $0x8] sm:$0xff]  ;;  %v432_v32 = vld [vmem:[#allocation2] sm:$0xff]  ;;  %v435_v34 = vld [vmem:[#allocation2 + $0x18] sm:$0xff] }
  0x71   : > { %738 = vmatpush3.bf16.msra.mxu0 %v735_v2  ;;  %755 = vmatpush3.bf16.msra.mxu1 %v735_v2  ;;  %v434_v38 = vld [vmem:[#allocation2 + $0x10] sm:$0xff]  ;;  %v437_v40 = vld [vmem:[#allocation2 + $0x28] sm:$0xff]  ;;  %v436_v44 = vld [vmem:[#allocation2 + $0x20] sm:$0xff] }
  0x72   : > { %207 = vxpose.xlu0.b32.cont [2/8] (short) %v199_v1, 128  ;;  %740 = vmatprep.subr.bf16.mxu0 %v739_v5  ;;  %v439_v46 = vld [vmem:[#allocation2 + $0x38] sm:$0xff]  ;;  %v438_v50 = vld [vmem:[#allocation2 + $0x30] sm:$0xff]  ;;  %v441_v52 = vld [vmem:[#allocation2 + $0x48] sm:$0xff] }
  0x73   : > { %752 = vmatprep.subr.bf16.mxu1 %v739_v5  ;;  %v440_v53 = vld [vmem:[#allocation2 + $0x40] sm:$0xff]  ;;  %v443_v58 = vld [vmem:[#allocation2 + $0x58] sm:$0xff]  ;;  %v442_v62 = vld [vmem:[#allocation2 + $0x50] sm:$0xff] }
  0x74   : > { %v445_v0 = vld [vmem:[#allocation2 + $0x68] sm:$0xff] }
  0x75   : > { %742 = vmatpush3.bf16.msra.mxu0 %v739_v5  ;;  %756 = vmatpush3.bf16.msra.mxu1 %v739_v5 }
  0x76   : > { %208 = vxpose.xlu0.b32.cont [3/8] (short) %v200_v3, 128  ;;  %744 = vmatprep.subr.bf16.mxu0 %v743_v8 }
  0x77   : > { %753 = vmatprep.subr.bf16.mxu1 %v743_v8 }
  0x79   : > { %746 = vmatpush3.bf16.msra.mxu0 %v743_v8  ;;  %757 = vmatpush3.bf16.msra.mxu1 %v743_v8 }
  0x7a   : > { %209 = vxpose.xlu0.b32.cont [4/8] (short) %v201_v4, 128  ;;  %748 = vmatprep.subr.bf16.mxu0 %v747_v11  ;;  %v444_v4 = vld [vmem:[#allocation2 + $0x60] sm:$0xff] }
  0x7b   : > { %754 = vmatprep.subr.bf16.mxu1 %v747_v11 }
  0x7d   : > { %750 = vmatpush3.bf16.msra.mxu0 %v747_v11  ;;  %758 = vmatpush3.bf16.msra.mxu1 %v747_v11 }
  0x7e   : > { %210 = vxpose.xlu0.b32.cont [5/8] (short) %v202_v6, 128  ;;  %v446_v6 = vld [vmem:[#allocation2 + $0x70] sm:$0xff] }
  0x82   : > { %211 = vxpose.xlu0.b32.cont [6/8] (short) %v203_v7, 128 }
  0x86   : > { %212 = vxpose.xlu0.b32.cont [7/8] (short) %v204_v9, 128 }
  0x8a   : > { %213 = vxpose.xlu0.b32.end [8/8] (short) %v205_v10, 128  ;;  %v447_v10 = vld [vmem:[#allocation2 + $0x78] sm:$0xff] }
  0xee   : > { %v222_v12 = vpop.trf.xlu0 }
  0xef   : > { %711 = vmatprep.mubr.msk.f32.mxu0 %vm238_vm0, %v222_v12 }
  0xf2   : > { %v223_v13 = vpop.trf.xlu0 }
  0xf3   : > { %712 = vmatmul.mubr.msk.f32.vlgmr.msra.gmra.mrb[0].mxu0 %vm238_vm0, %v223_v13 }
  0xf6   : > { %v224_v14 = vpop.trf.xlu0 }
  0xf7   : > { %714 = vmatprep.mubr.msk.f32.mxu0 %vm238_vm0, %v224_v14 }
  0xfa   : > { %v225_v15 = vpop.trf.xlu0 }
  0xfb   : > { %715 = vmatmul.mubr.msk.f32.gmra.mrb[2].mxu0 %vm238_vm0, %v225_v15 }
  0xfe   : > { %v226_v16 = vpop.trf.xlu0 }
  0xff   : > { %717 = vmatprep.mubr.msk.f32.mxu0 %vm238_vm0, %v226_v16 }
 0x102   : > { %v227_v17 = vpop.trf.xlu0 }
 0x103   : > { %718 = vmatmul.mubr.msk.f32.gmra.mrb[4].mxu0 %vm238_vm0, %v227_v17 }
 0x106   : > { %v228_v18 = vpop.trf.xlu0 }
 0x107   : > { %720 = vmatprep.mubr.msk.f32.mxu0 %vm238_vm0, %v228_v18 }
 0x10a   : > { %v229_v19 = vpop.trf.xlu0 }
 0x10b   : > { %721 = vmatmul.mubr.msk.f32.gmra.mrb[6].mxu0 %vm238_vm0, %v229_v19 }
 0x10e   : > { %v230_v20 = vpop.trf.xlu0 }
 0x10f   : > { %723 = vmatprep.mubr.msk.f32.mxu1 %vm238_vm0, %v230_v20 }
 0x112   : > { %v231_v21 = vpop.trf.xlu0 }
 0x113   : > { %724 = vmatmul.mubr.msk.f32.vlgmr.msra.gmra.mrb[0].mxu1 %vm238_vm0, %v231_v21 }
 0x116   : > { %v232_v22 = vpop.trf.xlu0 }
 0x117   : > { %726 = vmatprep.mubr.msk.f32.mxu1 %vm238_vm0, %v232_v22 }
 0x11a   : > { %v233_v23 = vpop.trf.xlu0 }
 0x11b   : > { %727 = vmatmul.mubr.msk.f32.gmra.mrb[2].mxu1 %vm238_vm0, %v233_v23 }
 0x11e   : > { %v234_v24 = vpop.trf.xlu0 }
 0x11f   : > { %729 = vmatprep.mubr.msk.f32.mxu1 %vm238_vm0, %v234_v24 }
 0x122   : > { %v235_v25 = vpop.trf.xlu0 }
 0x123   : > { %730 = vmatmul.mubr.msk.f32.gmra.mrb[4].mxu1 %vm238_vm0, %v235_v25 }
 0x126   : > { %v236_v26 = vpop.trf.xlu0 }
 0x127   : > { %732 = vmatprep.mubr.msk.f32.mxu1 %vm238_vm0, %v236_v26 }
 0x12a   : > { %v237_v27 = vpop.trf.xlu0 }
 0x12b   : > { %733 = vmatmul.mubr.msk.f32.gmra.mrb[6].mxu1 %vm238_vm0, %v237_v27 }
 0x1c6   : > { %v713_v29 = vpop.f32.mrb[0].mxu0 }
 0x1c7   : > { %v353_v30 = vpop.f32.mrb[1].mxu0  ;;  %v449_v31 = vmul.f32 %v713_v29, %v433_v28 }
 0x1c8   : > { %v448_v33 = vmul.f32 %v432_v32, %v353_v30 }
 0x1c9   : > { %466 = vadd.xlane.f32.xlu1 %v449_v31 }
 0x1cd   : > { %464 = vadd.xlane.f32.xlu1 %v448_v33 }
 0x1ce   : > { %v716_v35 = vpop.f32.mrb[2].mxu0 }
 0x1cf   : > { %v451_v36 = vmul.f32 %v716_v35, %v435_v34  ;;  %v363_v37 = vpop.f32.mrb[3].mxu0 }
 0x1d0   : > { %v450_v39 = vmul.f32 %v434_v38, %v363_v37 }
 0x1d1   : > { %470 = vadd.xlane.f32.xlu1 %v451_v36 }
 0x1d5   : > { %468 = vadd.xlane.f32.xlu1 %v450_v39 }
 0x1d6   : > { %v719_v41 = vpop.f32.mrb[4].mxu0 }
 0x1d7   : > { %v453_v42 = vmul.f32 %v719_v41, %v437_v40  ;;  %v373_v43 = vpop.f32.mrb[5].mxu0 }
 0x1d8   : > { %v452_v45 = vmul.f32 %v436_v44, %v373_v43 }
 0x1d9   : > { %474 = vadd.xlane.f32.xlu1 %v453_v42 }
 0x1dd   : > { %472 = vadd.xlane.f32.xlu1 %v452_v45 }
 0x1de   : > { %v722_v47 = vpop.f32.mrb[6].mxu0 }
 0x1df   : > { %v455_v48 = vmul.f32 %v722_v47, %v439_v46  ;;  %v383_v49 = vpop.f32.mrb[7].mxu0 }
 0x1e0   : > { %v454_v51 = vmul.f32 %v438_v50, %v383_v49  ;;  %v1066_v49 = vmov (!%p665_p4), 0.0  }
 0x1e1   : > { %478 = vadd.xlane.f32.xlu1 %v455_v48  ;;  %521 = vst [vmem:[%s194_s22] sm:$0xff] (!%p665_p4), %v1066_v49 }
 0x1e5   : > { %476 = vadd.xlane.f32.xlu1 %v454_v51 }
 0x1e6   : > { %v725_v54 = vpop.f32.mrb[0].mxu1 }
 0x1e7   : > { %v457_v55 = vmul.f32 %v725_v54, %v441_v52  ;;  %v393_v56 = vpop.f32.mrb[1].mxu1 }
 0x1e8   : > { %v456_v57 = vmul.f32 %v440_v53, %v393_v56 }
 0x1e9   : > { %482 = vadd.xlane.f32.xlu1 %v457_v55 }
 0x1ea   : > { %480 = vadd.xlane.f32.xlu0 %v456_v57 }
 0x1ee   : > { %v728_v59 = vpop.f32.mrb[2].mxu1 }
 0x1ef   : > { %v459_v60 = vmul.f32 %v728_v59, %v443_v58  ;;  %v403_v61 = vpop.f32.mrb[3].mxu1 }
 0x1f0   : > { %v458_v63 = vmul.f32 %v442_v62, %v403_v61 }
 0x1f1   : > { %486 = vadd.xlane.f32.xlu1 %v459_v60 }
 0x1f5   : > { %484 = vadd.xlane.f32.xlu1 %v458_v63 }
 0x1f6   : > { %v731_v1 = vpop.f32.mrb[4].mxu1 }
 0x1f7   : > { %v461_v2 = vmul.f32 %v731_v1, %v445_v0  ;;  %v413_v3 = vpop.f32.mrb[5].mxu1 }
 0x1f8   : > { %v460_v5 = vmul.f32 %v444_v4, %v413_v3 }
 0x1f9   : > { %490 = vadd.xlane.f32.xlu1 %v461_v2 }
 0x1fd   : > { %488 = vadd.xlane.f32.xlu1 %v460_v5 }
 0x1fe   : > { %v734_v7 = vpop.f32.mrb[6].mxu1 }
 0x1ff   : > { %v423_v8 = vpop.f32.mrb[7].mxu1  ;;  %v463_v11 = vmul.f32 %v734_v7, %v447_v10 }
 0x200   : > { %v462_v9 = vmul.f32 %v446_v6, %v423_v8 }
 0x202   : > { %492 = vadd.xlane.f32.xlu1 %v462_v9 }
 0x206   : > { %494 = vadd.xlane.f32.xlu1 %v463_v11 }
 0x256   : > { %v467_v12 = vpop.xlane.xlu1 %466 }
 0x25a   : > { %v465_v13 = vpop.xlane.xlu1 %464 }
 0x25b   : > { %v496_v17 = vadd.f32 %v467_v12, %v465_v13 }
 0x25e   : > { %v471_v14 = vpop.xlane.xlu1 %470 }
 0x262   : > { %v469_v15 = vpop.xlane.xlu1 %468 }
 0x263   : > { %v497_v19 = vadd.f32 %v496_v17, %v469_v15 }
 0x265   : > { %v498_v21 = vadd.f32 %v497_v19, %v471_v14 }
 0x266   : > { %v475_v16 = vpop.xlane.xlu1 %474 }
 0x26a   : > { %v473_v18 = vpop.xlane.xlu1 %472 }
 0x26b   : > { %v499_v22 = vadd.f32 %v498_v21, %v473_v18 }
 0x26d   : > { %v500_v24 = vadd.f32 %v499_v22, %v475_v16 }
 0x26e   : > { %v479_v20 = vpop.xlane.xlu1 %478 }
 0x272   : > { %v477_v23 = vpop.xlane.xlu1 %476 }
 0x273   : > { %v501_v25 = vadd.f32 %v500_v24, %v477_v23 }
 0x275   : > { %v502_v27 = vadd.f32 %v501_v25, %v479_v20 }
 0x276   : > { %v483_v26 = vpop.xlane.xlu1 %482 }
 0x277   : > { %v481_v28 = vpop.xlane.xlu0 %480 }
 0x278   : > { %v503_v30 = vadd.f32 %v502_v27, %v481_v28 }
 0x27a   : > { %v504_v32 = vadd.f32 %v503_v30, %v483_v26 }
 0x27e   : > { %v487_v29 = vpop.xlane.xlu1 %486 }
 0x282   : > { %v485_v31 = vpop.xlane.xlu1 %484 }
 0x283   : > { %v505_v33 = vadd.f32 %v504_v32, %v485_v31 }
 0x285   : > { %v506_v35 = vadd.f32 %v505_v33, %v487_v29 }
 0x286   : > { %v491_v34 = vpop.xlane.xlu1 %490 }
 0x28a   : > { %v489_v36 = vpop.xlane.xlu1 %488 }
 0x28b   : > { %v507_v37 = vadd.f32 %v506_v35, %v489_v36 }
 0x28d   : > { %v508_v38 = vadd.f32 %v507_v37, %v491_v34 }
 0x28f   : > { %v493_v39 = vpop.xlane.xlu1 %492 }
 0x290   : > { %v509_v40 = vadd.f32 %v508_v38, %v493_v39 }
 0x293   : > { %v495_v41 = vpop.xlane.xlu1 %494 }
 0x294   : > { %v510_v42 = vadd.f32 %v509_v40, %v495_v41 }
 0x296   : > { %v511_v43 = vrot.slane %v510_v42, 4 }
 0x298   : > { %v512_v44 = vadd.f32 %v511_v43, %v510_v42 }
 0x29a   : > { %v513_v45 = vrot.slane %v512_v44, 2  ;;  %520 = sbr.rel (%p665_p4) target bundleno = 673 (0x2a1), region = 40 }
 0x29c   : > { %v514_v46 = vadd.f32 %v513_v45, %v512_v44 }
 0x29e   : > { %v515_v47 = vrot.slane %v514_v46, 1 }
 0x2a0   : > { %v516_v48 = vadd.f32 %v515_v47, %v514_v46 }
 0x2a1 PF: > { %v522_v50 = vld [vmem:[%s194_s22] sm:$0xff]  ;;  %s1409_s23 = sld [smem:[#allocation12_spill]]  ;;  %s1410_s26 = sld [smem:[#allocation14_spill]] }
 0x2a2   : > { %v523_v51 = vadd.f32 %v522_v50, %v516_v48  ;;  %s1411_s7 = sld [smem:[#allocation17_spill]]  ;;  %s539_s28 = sshll.u32 %s194_s22, 4  ;;  %s1310_s28 = int_to_ptr.vmem [resolvable:$true] %s539_s28 }
 0x2a3   : > { %s526_s15 = scalar_lea.sflag [#allocation4], %s192_s9  ;;  %s934_s8 = scalar_lea.vmem %s1310_s28, 128 }
 0x2a4   : > { %524 = vst [vmem:[%s194_s22] sm:$0xff] %v523_v51  ;;  %p935_p7 = scmp.ne.s32.totalorder %s1310_s28, %s934_s8  ;;  %s1067_s12 = smov [#allocation7]  }
 0x2a5   : > { %s938_s27 = sshll.u32 %s1067_s12, 4  ;;  %s939_s27 = int_to_ptr.vmem [resolvable:$false] %s938_s27 }
 0x2a6   : > { %s940_s30 = scalar_lea.vmem %s939_s27, 256  ;;  %p941_p0 = scmp.lt.s32.totalorder %s1310_s28, %s939_s27 }
 0x2a7   : > { %s667_s25 = sshll.u32 %s1409_s23, 7  ;;  %p1412_p9 = scmp.ne.s32.totalorder %s1410_s26, 0 }
 0x2a8   : > { %s1308_s29 = scalar_lea.hbm %s1411_s7, %s667_s25  ;;  %p942_p2 = scmp.lt.s32.totalorder %s940_s30, %s934_s8 }
 0x2a9   : > { %p936_p11 = pnand %p935_p7, %p1412_p9 }
 0x2aa   : > { %p943_p5 = por %p942_p2, %p941_p0 }
 0x2ab   : > { %p937_p13 = pneg %p936_p11 }
 0x2ad   : > { %p944_p8 = pnand %p943_p5, %p937_p13 }
 0x2af   : > { %947 = shalt.err (!%p944_p8)
}
 0x2b0   : > { %s948_s21 = scalar_lea.hbm %s1308_s29, 128  ;;  %s952_s17 = scalar_lea.hbm %s1411_s7, 256 }
 0x2b1   : > { %p949_p12 = scmp.ne.s32.totalorder %s1308_s29, %s948_s21  ;;  %p953_p10 = scmp.lt.u32.totalorder %s1308_s29, %s1411_s7 }
 0x2b2   : > { %p954_p3 = scmp.lt.u32.totalorder %s952_s17, %s948_s21  ;;  %p956_p7 = scmp.lt.u32.totalorder %s948_s21, %s1308_s29 }
 0x2b3   : > { %p950_p1 = pnand %p949_p12, %p1412_p9 }
 0x2b4   : > { %p955_p4 = por %p954_p3, %p953_p10 }
 0x2b5   : > { %p951_p6 = pneg %p950_p1 }
 0x2b6   : > { %p957_p11 = por %p956_p7, %p955_p4 }
 0x2b8   : > { %p958_p13 = pnand %p957_p11, %p951_p6 }
 0x2ba   : > { %961 = shalt.err (!%p958_p13)
}
 0x2bb   : > { %765 = dma.vmem_to_hbm [thread:$0]  (%p1412_p9), %s1310_s28, 128, %s1308_s29, %s526_s15  }
 0x2bc PF: > { %s1413_s22 = sld [smem:[#allocation11_spill]]  ;;  %s1414_s23 = sld [smem:[#allocation15_spill]] }
 0x2bd   : > { %p782_p0 = scmp.ge.s32.totalorder %s1060_s19, 2 }
 0x2c2   : > { %s551_s25 = sand.u32 1, %s1413_s22   ;;  %p1415_p2 = scmp.ne.s32.totalorder %s1414_s23, 0 }
 0x2c3   : > { %s552_s24 = scalar_lea.sflag [#allocation4], %s551_s25 }
 0x2c4   : > { %p776_p5 = pnand %p782_p0, %p1415_p2 }
 0x2c6   : > { %1015 = dma.done.wait (!%p776_p5), %s552_s24, 128  }
 0x2c7   : > { %1017 = vsyncadd (!%p776_p5), %s552_s24, 4294967168  ;;  %s19_s19 = sadd.s32 1, %s1060_s19   ;;  %s1416_s15 = sld [smem:[#allocation13_spill]] }
 0x2c8   : > { %p16_p8 = scmp.ge.s32.totalorder %s19_s19, 6   ;;  %s1417_s9 = smov %s1024_s10 }
 0x2c9   : > { %s1418_s10 = smov %s1028_s11  ;;  %s1419_s11 = smov %s1219_s6 }
 0x2ca   : > { %s1420_s12 = smov %s1036_s13  ;;  %s1421_s13 = smov %s1040_s14 }
 0x2cb   : > { %s1422_s14 = smov %s1222_s0  ;;  %s1423_s16 = smov %s1056_s18 }
 0x2cc   : > { %s1424_s17 = smov %s1427_s4  ;;  %s1425_s18 = smov %s1431_s5 }
 0x2cd   :  { %18 = sbr.rel (!%p16_p8) target bundleno = 13 (0xd), region = 82 }
 0x2d4   :  { %557 = vsyncpa [#allocation3], 1 }
 0x2d5   :  { %559 = vsyncpa [#allocation3 + $0x1], 1 }
 0x2d6   :  { %560 = vsyncpa [#allocation6], 1 }
 0x2d7   :  { %562 = vsyncpa [#allocation6 + $0x1], 1 }
 0x2d8   :  { %563 = vsyncpa [#allocation4], 1 }
 0x2d9   :  { %565 = vsyncpa [#allocation4 + $0x1], 1 }

</bundles_post_ra>
